<compile_context>
chip_gen: v7x
topology: tpu7x:2x2x1
jax: 0.10.0
libtpu: 0.0.40
codegen_flags: <defaults>
</compile_context>

<pallas_src>
import jax
import jax.numpy as jnp
from jax.experimental import pallas as pl
from jax.experimental.pallas import tpu as pltpu

LANE = 128     # TPU vreg lane width
SUBLANE = 8    # TPU vreg sublane width

VMEM_LIMIT_BYTES = 32 * 1024 * 1024   # explicit scoped-VMEM cap (> v5e's 16 MiB default)
VMEM_BUDGET_BYTES = 24 * 1024 * 1024  # what the tile-size heuristic budgets against


def _round_up(x, m):
    return ((x + m - 1) // m) * m


# ----------------------------- Pallas kernel ------------------------------- #

def _critic_mlp_kernel(x_ref, w1_ref, b1_ref, w2_ref, b2_ref, w3_ref, b3_ref,
                       o_ref):
    # Input cast fused into the kernel (VPU, hidden under MXU work).
    x = x_ref[...].astype(w1_ref.dtype)

    # Layer 1: single MXU matmul over the concatenated (obs, act) features.
    h1 = jnp.dot(x, w1_ref[...], preferred_element_type=jnp.float32)
    h1 = jnp.maximum(h1 + b1_ref[...], 0.0)            # f32 bias/ReLU epilogue (VPU)

    # Layer 2: Linear + ReLU (bf16 MXU operands, f32 accumulation).
    h2 = jnp.dot(h1.astype(w2_ref.dtype), w2_ref[...],
                 preferred_element_type=jnp.float32)
    h2 = jnp.maximum(h2 + b2_ref[...], 0.0)

    # Layer 3: degenerate (d_h2 x 1) head -> VPU multiply + lane reduction
    # instead of an N=1 MXU pass.
    out = jnp.sum(h2 * w3_ref[...], axis=-1, keepdims=True) + b3_ref[...]
    o_ref[...] = out.astype(o_ref.dtype)


# ------------------------------- Wrapper ----------------------------------- #

def _pick_batch_tile(B, block_b, d_h1p, d_h2p):
    """Batch tile: >=2 grid steps for v7x dual-TC sharding, VMEM-budgeted."""
    if B <= SUBLANE:
        return B                                    # single full-array block
    # Per-row VMEM: lane-padded, double-buffered input/output blocks (f32)
    # plus f32/bf16 temporaries for h1/h2 inside the kernel.
    per_row = (2 * 2 * 4 * LANE) + 6 * d_h1p + 6 * d_h2p
    tb_cap = max(SUBLANE, (VMEM_BUDGET_BYTES // per_row) // SUBLANE * SUBLANE)
    tb = min(block_b, tb_cap, _round_up(pl.cdiv(B, 2), SUBLANE))
    return max(SUBLANE, tb)


def critic_forward(obs, action, kernel_params, *, n_agents, observation_space,
                   action_space, block_b=4096):
    """Mirrors Critic.forward: reshape, concat, 3-layer MLP."""
    full_obs = n_agents * observation_space
    full_act = n_agents * action_space

    w1, b1, w2, b2, w3, b3 = kernel_params
    d_in = w1.shape[0]
    d_h1p = w1.shape[1]
    d_h2p = w2.shape[1]
    assert d_in == full_obs + full_act

    # Glue (plain JAX): reshape + concat in f32 (matches torch.cat order:
    # obs first, act second).  The bf16 cast happens inside the kernel.
    x = jnp.concatenate(
        [obs.reshape(-1, full_obs).astype(jnp.float32),
         action.reshape(-1, full_act).astype(jnp.float32)], axis=1)
    B = x.shape[0]

    tb = _pick_batch_tile(B, block_b, d_h1p, d_h2p)
    nb = pl.cdiv(B, tb)

    # Constant index_maps: weights/biases stay VMEM-resident across grid steps
    # (block index unchanged between consecutive iterations -> no re-DMA).
    const = lambda a: pl.BlockSpec(a.shape, lambda i: (0,) * a.ndim)

    weight_bytes = sum(int(a.size) * int(a.dtype.itemsize)
                       for a in kernel_params)
    cost = pl.CostEstimate(
        flops=2 * B * (d_in * d_h1p + d_h1p * d_h2p + d_h2p),
        transcendentals=0,
        bytes_accessed=B * d_in * 4 + weight_bytes + B * 4,
    )

    return pl.pallas_call(
        _critic_mlp_kernel,
        out_shape=jax.ShapeDtypeStruct((B, 1), jnp.float32),
        grid_spec=pltpu.PrefetchScalarGridSpec(
            num_scalar_prefetch=0,
            grid=(nb,),
            in_specs=[
                pl.BlockSpec((tb, d_in), lambda i: (i, 0)),   # x batch tile
                const(w1), const(b1),                         # resident weights
                const(w2), const(b2), const(w3), const(b3),
            ],
            out_specs=pl.BlockSpec((tb, 1), lambda i: (i, 0)),
        ),
        compiler_params=pltpu.CompilerParams(
            dimension_semantics=("parallel",),     # shard batch tiles across TCs
            vmem_limit_bytes=VMEM_LIMIT_BYTES,
        ),
        cost_estimate=cost,
    )(x, w1, b1, w2, b2, w3, b3)


# ------------------------- Deterministic param init ------------------------ #

def _xavier_uniform(key, fan_in, fan_out):
    bound = (6.0 / (fan_in + fan_out)) ** 0.5
    # Stored as (in, out) so the kernel computes x @ W directly.
    return jax.random.uniform(key, (fan_in, fan_out), jnp.float32,
                              minval=-bound, maxval=bound)


def _torch_default_bias(key, fan_in, fan_out):
    # torch.nn.Linear default bias init: U(-1/sqrt(fan_in), 1/sqrt(fan_in)).
    # (init_weights in the spec only resets .weight, so bias keeps its default.)
    bound = 1.0 / (fan_in ** 0.5)
    return jax.random.uniform(key, (1, fan_out), jnp.float32,
                              minval=-bound, maxval=bound)


def init_critic_params(key, n_agents, observation_space, action_space):
    full_obs = n_agents * observation_space
    full_act = n_agents * action_space
    d_in, d_h1, d_h2 = full_obs + full_act, full_obs * 16, full_obs * 8
    ks = jax.random.split(key, 6)
    return {
        "w1": _xavier_uniform(ks[0], d_in, d_h1),
        "b1": _torch_default_bias(ks[1], d_in, d_h1),
        "w2": _xavier_uniform(ks[2], d_h1, d_h2),
        "b2": _torch_default_bias(ks[3], d_h1, d_h2),
        "w3": _xavier_uniform(ks[4], d_h2, 1),
        "b3": _torch_default_bias(ks[5], d_h2, 1),
    }


def prepare_kernel_params(params, *, compute_dtype=jnp.bfloat16):
    """One-time prep: zero-pad hidden dims to the 128 lane width, cast MXU
    operands (W1, W2) to the compute dtype; biases / head weights stay f32."""
    w1, b1 = params["w1"], params["b1"]
    w2, b2 = params["w2"], params["b2"]
    w3, b3 = params["w3"], params["b3"]

    d_h1, d_h2 = w1.shape[1], w2.shape[1]
    d_h1p, d_h2p = _round_up(d_h1, LANE), _round_up(d_h2, LANE)

    pad_cols = lambda a, n: jnp.pad(a, ((0, 0), (0, n - a.shape[1])))

    w1p = pad_cols(w1, d_h1p)                            # W1 kept whole
    b1p = pad_cols(b1, d_h1p)
    w2p = jnp.pad(w2, ((0, d_h1p - d_h1), (0, d_h2p - d_h2)))
    b2p = pad_cols(b2, d_h2p)
    w3p = pad_cols(w3.reshape(1, d_h2), d_h2p)           # row vector, VPU head

    return (w1p.astype(compute_dtype), b1p.astype(jnp.float32),
            w2p.astype(compute_dtype), b2p.astype(jnp.float32),
            w3p.astype(jnp.float32), b3.astype(jnp.float32))


# ---------------------------------- Main ----------------------------------- #

if __name__ == "__main__":
    n_agents = 2
    observation_space = 4
    action_space = 2
    batch = 8

    key = jax.random.PRNGKey(0)
    k_params, k_obs, k_act = jax.random.split(key, 3)

    params = init_critic_params(k_params, n_agents, observation_space,
                                action_space)
    kparams = prepare_kernel_params(params, compute_dtype=jnp.bfloat16)

    # Inputs shaped like (batch, n_agents, space); forward() flattens them.
    obs = jax.random.normal(k_obs, (batch, n_agents, observation_space),
                            jnp.float32)
    action = jax.random.normal(k_act, (batch, n_agents, action_space),
                               jnp.float32)

    q = critic_forward(obs, action, kparams,
                       n_agents=n_agents,
                       observation_space=observation_space,
                       action_space=action_space)
    q = jax.block_until_ready(q)
    assert q.shape == (batch, 1)

    # Reference 1: identical math to the kernel (bf16 matmul operands, f32 acc).
    w1, b1, w2, b2, w3, b3 = kparams
    x = jnp.concatenate([obs.reshape(batch, -1), action.reshape(batch, -1)],
                        axis=1)
    h1 = jnp.maximum(
        jnp.dot(x.astype(w1.dtype), w1, preferred_element_type=jnp.float32)
        + b1, 0.0)
    h2 = jnp.maximum(
        jnp.dot(h1.astype(w2.dtype), w2, preferred_element_type=jnp.float32)
        + b2, 0.0)
    ref_same_math = jnp.sum(h2 * w3, axis=-1, keepdims=True) + b3
    assert jnp.allclose(q, ref_same_math, atol=2e-3, rtol=2e-3)

    # Reference 2: full-f32 torch-equivalent forward (loose: bf16 rounding).
    h1f = jnp.maximum(x @ params["w1"] + params["b1"], 0.0)
    h2f = jnp.maximum(h1f @ params["w2"] + params["b2"], 0.0)
    ref_f32 = h2f @ params["w3"] + params["b3"]
    assert jnp.allclose(q, ref_f32, atol=1e-1, rtol=1e-1)

    print("KERNEL_OK")
</pallas_src>

<mosaic_0001>
module attributes {stable_mosaic.version = 11 : i64} {
  func.func @_critic_mlp_kernel(%arg0: i32, %arg1: memref<8x12xf32, #tpu.memory_space<vmem>>, %arg2: memref<12x128xbf16, #tpu.memory_space<vmem>>, %arg3: memref<1x128xf32, #tpu.memory_space<vmem>>, %arg4: memref<128x128xbf16, #tpu.memory_space<vmem>>, %arg5: memref<1x128xf32, #tpu.memory_space<vmem>>, %arg6: memref<1x128xf32, #tpu.memory_space<vmem>>, %arg7: memref<1x1xf32, #tpu.memory_space<vmem>>, %arg8: memref<8x1xf32, #tpu.memory_space<vmem>>) attributes {dimension_semantics = [#tpu.dimension_semantics<parallel>], iteration_bounds = array<i64: 1>, scalar_prefetch = 0 : i64, scratch_operands = 0 : i64, tpu.core_type = #tpu.core_type<tc>, window_params = [{transform_indices = @transform_0, window_bounds = array<i64: 8, 12>}, {pipeline_mode = #tpu.pipeline_mode<synchronous>, transform_indices = @transform_1, window_bounds = array<i64: 12, 128>}, {pipeline_mode = #tpu.pipeline_mode<synchronous>, transform_indices = @transform_2, window_bounds = array<i64: 1, 128>}, {pipeline_mode = #tpu.pipeline_mode<synchronous>, transform_indices = @transform_3, window_bounds = array<i64: 128, 128>}, {pipeline_mode = #tpu.pipeline_mode<synchronous>, transform_indices = @transform_4, window_bounds = array<i64: 1, 128>}, {pipeline_mode = #tpu.pipeline_mode<synchronous>, transform_indices = @transform_5, window_bounds = array<i64: 1, 128>}, {pipeline_mode = #tpu.pipeline_mode<synchronous>, transform_indices = @transform_6, window_bounds = array<i64: 1, 1>}, {transform_indices = @transform_7, window_bounds = array<i64: 8, 1>}]} {
    %c0 = arith.constant 0 : index
    %c0_0 = arith.constant 0 : index
    %0 = vector.load %arg1[%c0, %c0_0] : memref<8x12xf32, #tpu.memory_space<vmem>>, vector<8x12xf32>
    %1 = arith.truncf %0 : vector<8x12xf32> to vector<8x12xbf16>
    %c0_1 = arith.constant 0 : index
    %c0_2 = arith.constant 0 : index
    %2 = vector.load %arg2[%c0_1, %c0_2] : memref<12x128xbf16, #tpu.memory_space<vmem>>, vector<12x128xbf16>
    %cst = arith.constant dense<0.000000e+00> : vector<8x128xf32>
    %3 = tpu.matmul %1, %2, %cst {dimension_numbers = #tpu.dot_dimension_numbers<[1], [0], [0], [1], [0, 0, 1, 1], [], []>} : vector<8x12xbf16>, vector<12x128xbf16>, vector<8x128xf32> -> vector<8x128xf32>
    %c0_3 = arith.constant 0 : index
    %c0_4 = arith.constant 0 : index
    %4 = vector.load %arg3[%c0_3, %c0_4] : memref<1x128xf32, #tpu.memory_space<vmem>>, vector<1x128xf32>
    %5 = vector.broadcast %4 : vector<1x128xf32> to vector<8x128xf32>
    %6 = arith.addf %3, %5 : vector<8x128xf32>
    %cst_5 = arith.constant 0.000000e+00 : f32
    %7 = vector.broadcast %cst_5 : f32 to vector<8x128xf32>
    %8 = arith.maximumf %6, %7 : vector<8x128xf32>
    %9 = arith.truncf %8 : vector<8x128xf32> to vector<8x128xbf16>
    %c0_6 = arith.constant 0 : index
    %c0_7 = arith.constant 0 : index
    %10 = vector.load %arg4[%c0_6, %c0_7] : memref<128x128xbf16, #tpu.memory_space<vmem>>, vector<128x128xbf16>
    %cst_8 = arith.constant dense<0.000000e+00> : vector<8x128xf32>
    %11 = tpu.matmul %9, %10, %cst_8 {dimension_numbers = #tpu.dot_dimension_numbers<[1], [0], [0], [1], [0, 0, 1, 1], [], []>} : vector<8x128xbf16>, vector<128x128xbf16>, vector<8x128xf32> -> vector<8x128xf32>
    %c0_9 = arith.constant 0 : index
    %c0_10 = arith.constant 0 : index
    %12 = vector.load %arg5[%c0_9, %c0_10] : memref<1x128xf32, #tpu.memory_space<vmem>>, vector<1x128xf32>
    %13 = vector.broadcast %12 : vector<1x128xf32> to vector<8x128xf32>
    %14 = arith.addf %11, %13 : vector<8x128xf32>
    %cst_11 = arith.constant 0.000000e+00 : f32
    %15 = vector.broadcast %cst_11 : f32 to vector<8x128xf32>
    %16 = arith.maximumf %14, %15 : vector<8x128xf32>
    %c0_12 = arith.constant 0 : index
    %c0_13 = arith.constant 0 : index
    %17 = vector.load %arg6[%c0_12, %c0_13] : memref<1x128xf32, #tpu.memory_space<vmem>>, vector<1x128xf32>
    %18 = vector.broadcast %17 : vector<1x128xf32> to vector<8x128xf32>
    %19 = arith.mulf %16, %18 : vector<8x128xf32>
    %cst_14 = arith.constant dense<0.000000e+00> : vector<8xf32>
    %20 = vector.multi_reduction <add>, %19, %cst_14 [1] : vector<8x128xf32> to vector<8xf32>
    %21 = vector.shape_cast %20 : vector<8xf32> to vector<8x1xf32>
    %c0_15 = arith.constant 0 : index
    %c0_16 = arith.constant 0 : index
    %22 = vector.load %arg7[%c0_15, %c0_16] : memref<1x1xf32, #tpu.memory_space<vmem>>, vector<1x1xf32>
    %23 = vector.broadcast %22 : vector<1x1xf32> to vector<8x1xf32>
    %24 = arith.addf %21, %23 : vector<8x1xf32>
    %c0_17 = arith.constant 0 : index
    %c0_18 = arith.constant 0 : index
    %25 = vector.load %arg8[%c0_17, %c0_18] : memref<8x1xf32, #tpu.memory_space<vmem>>, vector<8x1xf32>
    tpu.vector_store %arg8[%c0_17, %c0_18], %24 {strides = array<i32>} : memref<8x1xf32, #tpu.memory_space<vmem>>, vector<8x1xf32>,
    return
  }
  func.func @transform_0(%arg0: i32) -> (i32, i32) {
    %c0_i32 = arith.constant 0 : i32
    %c0_i32_0 = arith.constant 0 : i32
    return %arg0, %c0_i32 : i32, i32
  }
  func.func @transform_1(%arg0: i32) -> (i32, i32) {
    %c0_i32 = arith.constant 0 : i32
    %c0_i32_0 = arith.constant 0 : i32
    %c0_i32_1 = arith.constant 0 : i32
    return %c0_i32, %c0_i32_0 : i32, i32
  }
  func.func @transform_2(%arg0: i32) -> (i32, i32) {
    %c0_i32 = arith.constant 0 : i32
    %c0_i32_0 = arith.constant 0 : i32
    %c0_i32_1 = arith.constant 0 : i32
    return %c0_i32, %c0_i32_0 : i32, i32
  }
  func.func @transform_3(%arg0: i32) -> (i32, i32) {
    %c0_i32 = arith.constant 0 : i32
    %c0_i32_0 = arith.constant 0 : i32
    %c0_i32_1 = arith.constant 0 : i32
    return %c0_i32, %c0_i32_0 : i32, i32
  }
  func.func @transform_4(%arg0: i32) -> (i32, i32) {
    %c0_i32 = arith.constant 0 : i32
    %c0_i32_0 = arith.constant 0 : i32
    %c0_i32_1 = arith.constant 0 : i32
    return %c0_i32, %c0_i32_0 : i32, i32
  }
  func.func @transform_5(%arg0: i32) -> (i32, i32) {
    %c0_i32 = arith.constant 0 : i32
    %c0_i32_0 = arith.constant 0 : i32
    %c0_i32_1 = arith.constant 0 : i32
    return %c0_i32, %c0_i32_0 : i32, i32
  }
  func.func @transform_6(%arg0: i32) -> (i32, i32) {
    %c0_i32 = arith.constant 0 : i32
    %c0_i32_0 = arith.constant 0 : i32
    %c0_i32_1 = arith.constant 0 : i32
    return %c0_i32, %c0_i32_0 : i32, i32
  }
  func.func @transform_7(%arg0: i32) -> (i32, i32) {
    %c0_i32 = arith.constant 0 : i32
    %c0_i32_0 = arith.constant 0 : i32
    return %arg0, %c0_i32 : i32, i32
  }
}

</mosaic_0001>

<bundles_post_ra>
// kernel: tpu_custom_call.1
= control target key start
LH: loop header
LB: loop body
LE: loop exit
PB: predicated region body
PF: predicated region fallthrough
CT: control target
= control target key end

     0   :  { %s513_s0 = inlined_call_operand.hbm [shape: f32[8,12], index: 0, kind: input, shape index: {}]   ;;  %s514_s1 = inlined_call_operand.hbm [shape: bf16[12,128], index: 1, kind: input, shape index: {}]   ;;  %s515_s2 = inlined_call_operand.vmem [shape: f32[1,128], index: 2, kind: input, shape index: {}]   ;;  %s516_s3 = inlined_call_operand.hbm [shape: bf16[128,128], index: 3, kind: input, shape index: {}]   ;;  %s517_s4 = inlined_call_operand.vmem [shape: f32[1,128], index: 4, kind: input, shape index: {}]   ;;  %s518_s5 = inlined_call_operand.vmem [shape: f32[1,128], index: 5, kind: input, shape index: {}]   ;;  %s519_s6 = inlined_call_operand.<no memory space> [shape: f32[1,1], index: 6, kind: input, shape index: {}]   ;;  %s520_s7 = inlined_call_operand.vmem [shape: f32[8,1], index: 7, kind: output, shape index: {}]  }
   0x1   :  { %v12_v0 = vstv %s519_s6 }
   0x2   :  { %13 = vst [vmem:[#allocation2] sm:$0x1] %v12_v0 }
   0x3   :  { %14 = vsyncpa [#allocation4], 0 }
   0x4   :  { %15 = vsyncpa [#allocation6], 0  ;;  %s409_s26 = smov [#allocation5]   ;;  %s339_s30 = scalar_lea.hbm %s514_s1, 128 }
   0x5   :  { %s31_s27 = sshll.u32 %s409_s26, 4  ;;  %p340_p0 = scmp.ne.s32.totalorder %s514_s1, %s339_s30  ;;  %s32_s27 = int_to_ptr.vmem [resolvable:$true] %s31_s27 }
   0x6   :  { %p343_p1 = scmp.lt.u32.totalorder %s339_s30, %s514_s1 }
   0x8   :  { %p345_p2 = pnand %p343_p1, %p340_p0 }
   0xa   :  { %348 = shalt.err (!%p345_p2)
}
   0xb   :  { %s349_s6 = scalar_lea.vmem %s32_s27, 128  ;;  %p354_p4 = scmp.lt.s32.totalorder %s32_s27, %s32_s27 }
   0xc   :  { %p350_p3 = scmp.ne.s32.totalorder %s32_s27, %s349_s6  ;;  %p355_p5 = scmp.lt.s32.totalorder %s349_s6, %s349_s6 }
   0xe   :  { %p356_p6 = por %p355_p5, %p354_p4 }
  0x10   :  { %p357_p7 = pnand %p356_p6, %p350_p3 }
  0x12   :  { %360 = shalt.err (!%p357_p7)
}
  0x13   :  { %s410_s12 = smov 64   ;;  %s411_s13 = smov 4  }
  0x14   :  { %37 = dma.hbm_to_vmem [thread:$0]  %s514_s1, 128, %s32_s27, [#allocation6], %s410_s12, %s410_s12, %s411_s13  }
  0x15   :  { %s412_s16 = smov [#allocation3]   ;;  %s413_s18 = smov [#allocation7]  }
  0x16   :  { %s22_s17 = sshll.u32 %s412_s16, 4  ;;  %s45_s19 = sshll.u32 %s413_s18, 4  ;;  %s23_s17 = int_to_ptr.vmem [resolvable:$true] %s22_s17  ;;  %s46_s19 = int_to_ptr.vmem [resolvable:$true] %s45_s19 }
  0x17   :  { %s361_s22 = scalar_lea.hbm %s513_s0, 128 }
  0x18   :  { %p362_p8 = scmp.ne.s32.totalorder %s513_s0, %s361_s22  ;;  %p365_p9 = scmp.lt.u32.totalorder %s361_s22, %s513_s0 }
  0x1a   :  { %p367_p10 = pnand %p365_p9, %p362_p8 }
  0x1c   :  { %370 = shalt.err (!%p367_p10)
}
  0x1d   :  { %s371_s1 = scalar_lea.vmem %s23_s17, 128  ;;  %p376_p12 = scmp.lt.s32.totalorder %s23_s17, %s23_s17 }
  0x1e   :  { %p372_p11 = scmp.ne.s32.totalorder %s23_s17, %s371_s1  ;;  %p377_p13 = scmp.lt.s32.totalorder %s371_s1, %s371_s1 }
  0x20   :  { %p378_p0 = por %p377_p13, %p376_p12 }
  0x22   :  { %p379_p1 = pnand %p378_p0, %p372_p11 }
  0x24   :  { %382 = shalt.err (!%p379_p1)
}
  0x25   :  { %25 = dma.hbm_to_vmem [thread:$0]  %s513_s0, 128, %s23_s17, [#allocation4]  }
  0x26   :  { %s383_s8 = scalar_lea.hbm %s516_s3, 1024 }
  0x27   :  { %p384_p2 = scmp.ne.s32.totalorder %s516_s3, %s383_s8  ;;  %p387_p3 = scmp.lt.u32.totalorder %s383_s8, %s516_s3 }
  0x29   :  { %p389_p4 = pnand %p387_p3, %p384_p2 }
  0x2b   :  { %392 = shalt.err (!%p389_p4)
}
  0x2c   :  { %s393_s14 = scalar_lea.vmem %s46_s19, 1024  ;;  %p398_p6 = scmp.lt.s32.totalorder %s46_s19, %s46_s19 }
  0x2d   :  { %p394_p5 = scmp.ne.s32.totalorder %s46_s19, %s393_s14  ;;  %p399_p7 = scmp.lt.s32.totalorder %s393_s14, %s393_s14 }
  0x2f   :  { %p400_p8 = por %p399_p7, %p398_p6 }
  0x31   :  { %p401_p9 = pnand %p400_p8, %p394_p5 }
  0x33   :  { %404 = shalt.err (!%p401_p9)
}
  0x34   :  { %51 = dma.hbm_to_vmem [thread:$0]  %s516_s3, 1024, %s46_s19, [#allocation6], %s410_s12, %s410_s12, %s411_s13  }
  0x35   :  { %405 = dma.done.wait [#allocation4], 128  }
  0x36   :  { %406 = vsyncadd [#allocation4], 4294967168 }
  0x37   :  { %407 = dma.done.wait [#allocation6], 1152  }
  0x38   :  { %408 = vsyncadd [#allocation6], 4294966144  ;;  %v414_v1 = vmov 0.0   ;;  %vm415_vm0 = vmmov 0   ;;  %vm88_vm1 = vcmask 1045504   ;;  %v68_v3 = vld [vmem:[#allocation3] sm:$0xff] }
  0x39   :  { %297 = vmatprep.subr.bf16.mxu0 %v414_v1  ;;  %299 = vmatprep.mubr.msk.bf16.mxu0 %vm415_vm0, %v414_v1  ;;  %v330_v2 = vld [vmem:[#allocation5] sm:$0x3f]   ;;  %v69_v5 = vpack.c.bf16 %v68_v3, %v68_v3  ;;  %v331_v6 = vld [vmem:[#allocation7] sm:$0xff]   ;;  %vm84_vm2 = vcmask 97280   ;;  %v332_v7 = vld [vmem:[#allocation7 + $0x8] sm:$0xff]   ;;  %vm264_vm3 = vcmask 7168  }
  0x3a   :  { %303 = vmatprep.subr.bf16.mxu1 %v414_v1  ;;  %319 = vmatprep.mubr.msk.bf16.mxu1 %vm415_vm0, %v414_v1  ;;  %v90_v4 = vsel %vm88_vm1, %v330_v2, 0  ;;  %v333_v8 = vld [vmem:[#allocation7 + $0x10] sm:$0xff]   ;;  %v334_v9 = vld [vmem:[#allocation7 + $0x18] sm:$0xff]   ;;  %v335_v10 = vld [vmem:[#allocation7 + $0x20] sm:$0xff]  }
  0x3b   :  { %298 = vmatpush3.bf16.msra.mxu0 %v90_v4  ;;  %304 = vmatpush3.bf16.msra.mxu1 %v331_v6  ;;  %v336_v11 = vld [vmem:[#allocation7 + $0x28] sm:$0xff]   ;;  %v337_v12 = vld [vmem:[#allocation7 + $0x30] sm:$0xff]   ;;  %v338_v13 = vld [vmem:[#allocation7 + $0x38] sm:$0xff]  }
  0x3c   :  { %305 = vmatprep.subr.bf16.mxu1 %v414_v1  ;;  %v272_v14 = vld [vmem:[%s515_s2] ss:$0 sm:$0xff] }
  0x3d   :  { %v275_v22 = vld [vmem:[%s517_s4] ss:$0 sm:$0xff] }
  0x3e   :  { %300 = vmatmul.mubr.msk.bf16.vlgmr.msra.gmra.mrb[0].mxu0 %vm84_vm2, %v69_v5  ;;  %v284_v27 = vld [vmem:[%s518_s5] ss:$0 sm:$0xff] }
  0x3f   :  { %306 = vmatpush3.bf16.msra.mxu1 %v332_v7  ;;  %v285_v31 = vld [vmem:[#allocation2] ss:$0 sm:$0xff] }
  0x40   :  { %307 = vmatprep.subr.bf16.mxu1 %v414_v1 }
  0x43   :  { %308 = vmatpush3.bf16.msra.mxu1 %v333_v8 }
  0x44   :  { %309 = vmatprep.subr.bf16.mxu1 %v414_v1 }
  0x47   :  { %310 = vmatpush3.bf16.msra.mxu1 %v334_v9 }
  0x48   :  { %311 = vmatprep.subr.bf16.mxu1 %v414_v1 }
  0x4b   :  { %312 = vmatpush3.bf16.msra.mxu1 %v335_v10 }
  0x4c   :  { %313 = vmatprep.subr.bf16.mxu1 %v414_v1 }
  0x4f   :  { %314 = vmatpush3.bf16.msra.mxu1 %v336_v11 }
  0x50   :  { %315 = vmatprep.subr.bf16.mxu1 %v414_v1 }
  0x53   :  { %316 = vmatpush3.bf16.msra.mxu1 %v337_v12 }
  0x54   :  { %317 = vmatprep.subr.bf16.mxu1 %v414_v1 }
  0x57   :  { %318 = vmatpush3.bf16.msra.mxu1 %v338_v13 }
 0x111   :  { %v126_v15 = vpop.f32.mrb[0].mxu0 }
 0x112   :  { %v127_v16 = vadd.f32 %v272_v14, %v126_v15  ;;  %v301_v17 = vpop.f32.mrb[1].mxu0 }
 0x113   :  { %v129_v18 = vpop.f32.mrb[2].mxu0 }
 0x114   :  { %v132_v19 = vmax.f32 %v127_v16, 0.0  ;;  %v302_v20 = vpop.f32.mrb[3].mxu0 }
 0x116   :  { %v133_v21 = vpack.c.bf16 %v132_v19, %v132_v19 }
 0x118   :  { %320 = vmatmul.mubr.bf16.vlgmr.msra.gmra.mrb[0].mxu1 %v133_v21 }
 0x1eb   :  { %v239_v23 = vpop.f32.mrb[0].mxu1 }
 0x1ec   :  { %v240_v24 = vadd.f32 %v275_v22, %v239_v23  ;;  %v321_v25 = vpop.f32.mrb[1].mxu1 }
 0x1ed   :  { %v242_v26 = vpop.f32.mrb[2].mxu1 }
 0x1ee   :  { %v245_v28 = vmax.f32 %v240_v24, 0.0  ;;  %v322_v29 = vpop.f32.mrb[3].mxu1 }
 0x1f0   :  { %v253_v30 = vmul.f32 %v284_v27, %v245_v28 }
 0x1f2   :  { %254 = vadd.xlane.f32.xlu0 %v253_v30 }
 0x27f   :  { %v255_v32 = vpop.xlane.xlu0 %254 }
 0x280   :  { %v263_v33 = vadd.f32 %v285_v31, %v255_v32 }
 0x282   :  { %265 = vst.msk [vmem:[%s520_s7] sm:$0xff] %vm264_vm3, %v263_v33 }
 0x283   :  { %270 = vsyncpa [#allocation4], 1 }
 0x284   :  { %271 = vsyncpa [#allocation6], 1 }

</bundles_post_ra>
